<compile_context>
chip_gen: v7x
topology: tpu7x:2x2x1
jax: 0.10.0
libtpu: 0.0.40
codegen_flags: <defaults>
</compile_context>

<pallas_src>
import jax
import jax.numpy as jnp
from jax.experimental import pallas as pl
from jax.experimental.pallas import tpu as pltpu


# ----------------------------------------------------------------------------
# Pallas kernel: fused (2x2 s2 conv as GEMM) + BatchNorm affine for one
# (batch element, pixel tile).
# ----------------------------------------------------------------------------
def _conv_bn_kernel(p_ref, w_ref, scale_ref, shift_ref, o_ref):
    # p_ref:     [K, TN]    im2col patches (K = Cin*2*2), lane-dense pixel tile
    # w_ref:     [nOut, K]  flattened conv weight (OIHW order on K)
    # scale_ref: [nOut, 1]  gamma / sqrt(running_var + eps)
    # shift_ref: [nOut, 1]  beta - running_mean * scale
    # o_ref:     [nOut, TN]
    acc = jnp.dot(
        w_ref[...].astype(jnp.float32),
        p_ref[...].astype(jnp.float32),
        preferred_element_type=jnp.float32,
    )
    o_ref[...] = (acc * scale_ref[...] + shift_ref[...]).astype(o_ref.dtype)


def _pick_lane_tile(npix, k, nout, dtype_bytes=4, vmem_budget=8 * 1024 * 1024):
    """Largest lane tile that is a multiple of 128 (or the full dim) and keeps the
    double-buffered per-step footprint under a v7x-safe VMEM budget."""
    per_col = 2 * (k + nout) * dtype_bytes  # double-buffered input + output columns
    t = max(128, vmem_budget // max(per_col, 1))
    t = (t // 128) * 128
    if t >= npix:
        return npix  # full dim is always a legal block extent
    return t


def conv2x2s2_bn(x, weight, scale, shift):
    """2x2, stride-2, no-pad, bias-free conv fused with a per-channel affine (the
    BatchNorm in inference form).  x: [B, Cin, H, W] (NCHW).  Returns NCHW."""
    B, Cin, H, W = x.shape
    nOut = weight.shape[0]
    Ho, Wo = H // 2, W // 2
    x = x[:, :, : Ho * 2, : Wo * 2]  # match PyTorch floor behaviour for odd H/W
    Npix = Ho * Wo
    K = Cin * 4

    # im2col for the non-overlapping 2x2 patches (layout only; XLA handles it).
    # K-axis order is (cin, kh, kw) to match PyTorch's OIHW weight layout.
    patches = (
        x.reshape(B, Cin, Ho, 2, Wo, 2)
        .transpose(0, 1, 3, 5, 2, 4)
        .reshape(B, K, Npix)
    )
    w_flat = weight.reshape(nOut, K)
    scale2 = scale.reshape(nOut, 1).astype(jnp.float32)
    shift2 = shift.reshape(nOut, 1).astype(jnp.float32)

    tile_n = _pick_lane_tile(Npix, K, nOut)
    grid = (B, pl.cdiv(Npix, tile_n))

    out = pl.pallas_call(
        _conv_bn_kernel,
        out_shape=jax.ShapeDtypeStruct((B, nOut, Npix), x.dtype),
        grid_spec=pltpu.PrefetchScalarGridSpec(
            num_scalar_prefetch=0,
            grid=grid,
            in_specs=[
                pl.BlockSpec((None, K, tile_n), lambda b, j: (b, 0, j)),
                pl.BlockSpec((nOut, K), lambda b, j: (0, 0)),
                pl.BlockSpec((nOut, 1), lambda b, j: (0, 0)),
                pl.BlockSpec((nOut, 1), lambda b, j: (0, 0)),
            ],
            out_specs=pl.BlockSpec((None, nOut, tile_n), lambda b, j: (b, 0, j)),
        ),
        compiler_params=pltpu.CompilerParams(
            dimension_semantics=("parallel", "parallel"),
        ),
    )(patches, w_flat, scale2, shift2)

    return out.reshape(B, nOut, Ho, Wo)


# ----------------------------------------------------------------------------
# DownsampleD module (JAX side)
# ----------------------------------------------------------------------------
class DownsampleD:
    """JAX/Pallas port of the PyTorch DownsampleD module.
    BatchNorm is applied in inference form (running statistics), fused into the
    conv kernel as a per-channel scale/shift."""

    def __init__(self, nIn, nOut, stride, key=None, eps=1e-5):
        assert stride == 2
        if key is None:
            key = jax.random.PRNGKey(0)
        fan_in = nIn * 2 * 2
        bound = 1.0 / (fan_in ** 0.5)  # PyTorch Conv2d default (kaiming-uniform) bound
        self.conv_weight = jax.random.uniform(
            key, (nOut, nIn, 2, 2), jnp.float32, minval=-bound, maxval=bound
        )
        # BatchNorm2d parameters / running statistics (PyTorch defaults).
        self.bn_weight = jnp.ones((nOut,), jnp.float32)
        self.bn_bias = jnp.zeros((nOut,), jnp.float32)
        self.bn_running_mean = jnp.zeros((nOut,), jnp.float32)
        self.bn_running_var = jnp.ones((nOut,), jnp.float32)
        self.eps = eps

    def forward(self, x):
        scale = self.bn_weight * jax.lax.rsqrt(self.bn_running_var + self.eps)
        shift = self.bn_bias - self.bn_running_mean * scale
        # TODO(synk): training-mode BatchNorm (batch statistics) would need an extra
        # reduction pass over the conv output; only inference semantics are fused here.
        return conv2x2s2_bn(x, self.conv_weight, scale, shift)

    __call__ = forward


# ----------------------------------------------------------------------------
# Demo / self-test
# ----------------------------------------------------------------------------
if __name__ == "__main__":
    key = jax.random.PRNGKey(0)
    k_x, k_mod, k_g, k_b, k_m, k_v = jax.random.split(key, 6)

    B, nIn, nOut, H, W = 2, 4, 8, 16, 16
    x = jax.random.normal(k_x, (B, nIn, H, W), jnp.float32)

    model = DownsampleD(nIn, nOut, stride=2, key=k_mod)
    # Non-trivial BN parameters / running stats so the fused affine path is
    # actually exercised by the check (defaults would make it ~identity).
    model.bn_weight = jax.random.uniform(k_g, (nOut,), jnp.float32, minval=0.5, maxval=1.5)
    model.bn_bias = 0.1 * jax.random.normal(k_b, (nOut,), jnp.float32)
    model.bn_running_mean = 0.1 * jax.random.normal(k_m, (nOut,), jnp.float32)
    model.bn_running_var = jax.random.uniform(k_v, (nOut,), jnp.float32, minval=0.5, maxval=1.5)

    out = jax.block_until_ready(model(x))

    # Pure-JAX reference: lax conv + BN (running stats).
    ref_conv = jax.lax.conv_general_dilated(
        x, model.conv_weight, window_strides=(2, 2), padding="VALID",
        dimension_numbers=("NCHW", "OIHW", "NCHW"),
    )
    ref_scale = model.bn_weight / jnp.sqrt(model.bn_running_var + model.eps)
    ref_shift = model.bn_bias - model.bn_running_mean * ref_scale
    ref = ref_conv * ref_scale[None, :, None, None] + ref_shift[None, :, None, None]

    assert out.shape == (B, nOut, H // 2, W // 2), out.shape
    err = float(jnp.max(jnp.abs(out - ref)))
    assert jnp.allclose(out, ref, atol=1e-4, rtol=1e-4), f"max abs err = {err}"

    print("KERNEL_OK")
</pallas_src>

<mosaic_0001>
module attributes {stable_mosaic.version = 11 : i64} {
  func.func @_conv_bn_kernel(%arg0: i32, %arg1: i32, %arg2: memref<1x16x64xf32, #tpu.memory_space<vmem>>, %arg3: memref<8x16xf32, #tpu.memory_space<vmem>>, %arg4: memref<8x1xf32, #tpu.memory_space<vmem>>, %arg5: memref<8x1xf32, #tpu.memory_space<vmem>>, %arg6: memref<1x8x64xf32, #tpu.memory_space<vmem>>) attributes {dimension_semantics = [#tpu.dimension_semantics<parallel>, #tpu.dimension_semantics<parallel>], iteration_bounds = array<i64: 2, 1>, scalar_prefetch = 0 : i64, scratch_operands = 0 : i64, tpu.core_type = #tpu.core_type<tc>, window_params = [{transform_indices = @transform_0, window_bounds = array<i64: 1, 16, 64>}, {pipeline_mode = #tpu.pipeline_mode<synchronous>, transform_indices = @transform_1, window_bounds = array<i64: 8, 16>}, {pipeline_mode = #tpu.pipeline_mode<synchronous>, transform_indices = @transform_2, window_bounds = array<i64: 8, 1>}, {pipeline_mode = #tpu.pipeline_mode<synchronous>, transform_indices = @transform_3, window_bounds = array<i64: 8, 1>}, {transform_indices = @transform_4, window_bounds = array<i64: 1, 8, 64>}]} {
    %c0 = arith.constant 0 : index
    %c0_0 = arith.constant 0 : index
    %0 = vector.load %arg3[%c0, %c0_0] : memref<8x16xf32, #tpu.memory_space<vmem>>, vector<8x16xf32>
    %c0_1 = arith.constant 0 : index
    %c0_2 = arith.constant 0 : index
    %c0_3 = arith.constant 0 : index
    %1 = vector.load %arg2[%c0_1, %c0_2, %c0_3] : memref<1x16x64xf32, #tpu.memory_space<vmem>>, vector<1x16x64xf32>
    %2 = vector.shape_cast %1 : vector<1x16x64xf32> to vector<16x64xf32>
    %cst = arith.constant dense<0.000000e+00> : vector<8x64xf32>
    %3 = tpu.matmul %0, %2, %cst {dimension_numbers = #tpu.dot_dimension_numbers<[1], [0], [0], [1], [0, 0, 1, 1], [], []>} : vector<8x16xf32>, vector<16x64xf32>, vector<8x64xf32> -> vector<8x64xf32>
    %c0_4 = arith.constant 0 : index
    %c0_5 = arith.constant 0 : index
    %4 = vector.load %arg4[%c0_4, %c0_5] : memref<8x1xf32, #tpu.memory_space<vmem>>, vector<8x1xf32>
    %5 = vector.broadcast %4 : vector<8x1xf32> to vector<8x64xf32>
    %6 = arith.mulf %3, %5 : vector<8x64xf32>
    %c0_6 = arith.constant 0 : index
    %c0_7 = arith.constant 0 : index
    %7 = vector.load %arg5[%c0_6, %c0_7] : memref<8x1xf32, #tpu.memory_space<vmem>>, vector<8x1xf32>
    %8 = vector.broadcast %7 : vector<8x1xf32> to vector<8x64xf32>
    %9 = arith.addf %6, %8 : vector<8x64xf32>
    %c0_8 = arith.constant 0 : index
    %c0_9 = arith.constant 0 : index
    %c0_10 = arith.constant 0 : index
    %10 = vector.load %arg6[%c0_8, %c0_9, %c0_10] : memref<1x8x64xf32, #tpu.memory_space<vmem>>, vector<1x8x64xf32>
    %11 = vector.shape_cast %10 : vector<1x8x64xf32> to vector<8x64xf32>
    %12 = vector.shape_cast %9 : vector<8x64xf32> to vector<1x8x64xf32>
    tpu.vector_store %arg6[%c0_8, %c0_9, %c0_10], %12 {strides = array<i32>} : memref<1x8x64xf32, #tpu.memory_space<vmem>>, vector<1x8x64xf32>,
    return
  }
  func.func @transform_0(%arg0: i32, %arg1: i32) -> (i32, i32, i32) {
    %c0_i32 = arith.constant 0 : i32
    %c0_i32_0 = arith.constant 0 : i32
    return %arg0, %c0_i32, %arg1 : i32, i32, i32
  }
  func.func @transform_1(%arg0: i32, %arg1: i32) -> (i32, i32) {
    %c0_i32 = arith.constant 0 : i32
    %c0_i32_0 = arith.constant 0 : i32
    %c0_i32_1 = arith.constant 0 : i32
    return %c0_i32, %c0_i32_0 : i32, i32
  }
  func.func @transform_2(%arg0: i32, %arg1: i32) -> (i32, i32) {
    %c0_i32 = arith.constant 0 : i32
    %c0_i32_0 = arith.constant 0 : i32
    %c0_i32_1 = arith.constant 0 : i32
    return %c0_i32, %c0_i32_0 : i32, i32
  }
  func.func @transform_3(%arg0: i32, %arg1: i32) -> (i32, i32) {
    %c0_i32 = arith.constant 0 : i32
    %c0_i32_0 = arith.constant 0 : i32
    %c0_i32_1 = arith.constant 0 : i32
    return %c0_i32, %c0_i32_0 : i32, i32
  }
  func.func @transform_4(%arg0: i32, %arg1: i32) -> (i32, i32, i32) {
    %c0_i32 = arith.constant 0 : i32
    %c0_i32_0 = arith.constant 0 : i32
    return %arg0, %c0_i32, %arg1 : i32, i32, i32
  }
}

</mosaic_0001>

<bundles_post_ra>
// kernel: tpu_custom_call.1
= control target key start
LH: loop header
LB: loop body
LE: loop exit
PB: predicated region body
PF: predicated region fallthrough
CT: control target
= control target key end

     0   :  { %9 = vsyncpa [#allocation3], 0  ;;  %s850_s0 = inlined_call_operand.hbm [shape: f32[2,16,64], index: 0, kind: input, shape index: {}]   ;;  %s851_s1 = inlined_call_operand.vmem [shape: f32[8,16], index: 1, kind: input, shape index: {}]   ;;  %s852_s2 = inlined_call_operand.vmem [shape: f32[8,1], index: 2, kind: input, shape index: {}]   ;;  %s853_s3 = inlined_call_operand.vmem [shape: f32[8,1], index: 3, kind: input, shape index: {}]   ;;  %s854_s4 = inlined_call_operand.hbm [shape: f32[2,8,64], index: 4, kind: output, shape index: {}]  }
   0x1   :  { %11 = vsyncpa [#allocation3 + $0x1], 0 }
   0x2   :  { %12 = vsyncpa [#allocation4], 0 }
   0x3   :  { %14 = vsyncpa [#allocation4 + $0x1], 0  ;;  %s667_s15 = smov 0   ;;  %s669_s16 = smov 0  }
   0x4   :  { %s671_s17 = smov 0   ;;  %s673_s18 = smov 0  }
   0x5   :  { %s675_s19 = smov 0   ;;  %s677_s20 = smov 0  }
   0x6 LB: > { %s422_s21 = sadd.s32 4294967295, %s632_s20   ;;  %s423_s22 = sadd.s32 4294967294, %s632_s20   ;;  %s632_s20 = sphi %s677_s20, %s20_s20   ;;  %s628_s19 = sphi %s675_s19, %s869_s19   ;;  %s624_s18 = sphi %s673_s18, %s868_s18   ;;  %s620_s17 = sphi %s671_s17, %s867_s17   ;;  %s616_s16 = sphi %s669_s16, %s866_s16   ;;  %s612_s15 = sphi %s667_s15, %s865_s15  }
   0x7   : > { %s32_s23 = sadd.s32 1, %s628_s19  ;;  %s41_s24 = sadd.s32 1, %s620_s17 }
   0x8   : > { %p34_p0 = scmp.ge.s32.totalorder %s32_s23, 2  ;;  %p48_p1 = scmp.ne.s32.totalorder %s620_s17, %s616_s16 }
   0x9   : > { %p49_p2 = scmp.eq.s32.totalorder %s632_s20, 0  ;;  %p54_p3 = scmp.ne.s32.totalorder %s616_s16, %s612_s15 }
   0xa   : > { %s871_s23 = smov (%p34_p0, %s32_s23), 0  ;;  %p55_p5 = scmp.eq.s32.totalorder %s422_s21, 0 }
   0xb   : > { %p708_p4 = por %p49_p2, %p48_p1  ;;  %s36_s26 = ssub.s32 %s628_s19, %s871_s23 }
   0xc   : > { %p143_p6 = scmp.eq.s32.totalorder %s422_s21, 1  ;;  %p39_p7 = scmp.eq.s32.totalorder %s36_s26, 0 }
   0xd   : > { %p714_p8 = por %p55_p5, %p54_p3  ;;  %p149_p10 = scmp.eq.s32.totalorder %s423_s22, 1 }
   0xe   : > { %p718_p9 = por %p143_p6, %p48_p1  ;;  %p463_p13 = scmp.lt.s32.totalorder %s632_s20, 2 }
   0xf   : > { %s723_s29 = scalar_select %p39_p7, %s620_s17, %s41_s24  }
  0x10   : > { %s858_s28 = scalar_select %p718_p9, 1, 0 }
  0x11   : > { %p725_p11 = por %p149_p10, %p54_p3  ;;  %s178_s5 = sand.u32 1, %s620_s17  }
  0x12   : > { %s426_s6 = sshll.u32 %s178_s5, 4  ;;  %s437_s7 = sshll.u32 %s628_s19, 8 }
  0x13   : > { %s859_s30 = scalar_select %p725_p11, 1, 0 }
  0x14   : > { %s736_s10 = scalar_lea.hbm %s850_s0, %s437_s7  ;;  %s182_s11 = scalar_lea.vmem [#allocation2], %s426_s6 }
  0x15   : > { %s190_s12 = sshll.u32 %s182_s11, 4  ;;  %p742_p0 = pnand %p463_p13, %p708_p4  ;;  %s738_s12 = int_to_ptr.vmem [resolvable:$true] %s190_s12 }
  0x16   : > { %s747_s14 = scalar_lea.sflag [#allocation3], %s178_s5  ;;  %s520_s21 = scalar_lea.hbm %s736_s10, 256 }
  0x17   : > { %p521_p2 = scmp.ne.s32.totalorder %s736_s10, %s520_s21  ;;  %p522_p3 = pneg %p742_p0 }
  0x18   : > { %s525_s25 = scalar_lea.hbm %s850_s0, 512  ;;  %p526_p4 = scmp.lt.u32.totalorder %s736_s10, %s850_s0 }
  0x19   : > { %p523_p5 = pnand %p522_p3, %p521_p2  ;;  %p527_p7 = scmp.lt.u32.totalorder %s525_s25, %s520_s21 }
  0x1a   : > { %p529_p13 = scmp.lt.u32.totalorder %s520_s21, %s736_s10 }
  0x1b   : > { %p524_p6 = pneg %p523_p5  ;;  %p528_p10 = por %p527_p7, %p526_p4 }
  0x1d   : > { %p530_p12 = por %p529_p13, %p528_p10 }
  0x1f   : > { %p531_p1 = pnand %p530_p12, %p524_p6 }
  0x21   : > { %534 = shalt.err (!%p531_p1)
}
  0x22   : > { %s535_s5 = scalar_lea.vmem %s738_s12, 256  ;;  %s634_s7 = smov [#allocation2]  }
  0x23   : > { %p536_p2 = scmp.ne.s32.totalorder %s738_s12, %s535_s5  ;;  %s540_s8 = sshll.u32 %s634_s7, 4  ;;  %s541_s8 = int_to_ptr.vmem [resolvable:$false] %s540_s8 }
  0x24   : > { %s542_s9 = scalar_lea.vmem %s541_s8, 512  ;;  %p543_p9 = scmp.lt.s32.totalorder %s738_s12, %s541_s8 }
  0x25   : > { %p538_p5 = pnand %p536_p2, %p522_p3  ;;  %p544_p4 = scmp.lt.s32.totalorder %s542_s9, %s535_s5 }
  0x27   : > { %p539_p11 = pneg %p538_p5  ;;  %p545_p7 = por %p544_p4, %p543_p9 }
  0x29   : > { %p546_p10 = pnand %p545_p7, %p539_p11 }
  0x2b   : > { %549 = shalt.err (!%p546_p10)
}
  0x2c   : > { %s635_s11 = smov 128   ;;  %s636_s21 = smov 8  }
  0x2d   : > { %458 = dma.hbm_to_vmem [thread:$0]  (!%p742_p0), %s736_s10, 256, %s738_s12, %s747_s14, %s635_s11, %s635_s11, %s636_s21  }
  0x2e   : > { %p198_p12 = scmp.lt.s32.totalorder %s632_s20, 3  ;;  %p861_p1 = scmp.ge.s32.totalorder %s632_s20, 1 }
  0x30   : > { %p199_p3 = pnand %p861_p1, %p198_p12 }
  0x31   : > { %s779_s22 = sand.u32 (!%p199_p3), 1, %s616_s16  }
  0x32   : > { %202 = sbr.rel (%p199_p3) target bundleno = 295 (0x127), region = 36  ;;  %s430_s24 = sshll.u32 (!%p199_p3), %s779_s22, 4 }
  0x33   : > { %s205_s25 = scalar_lea.sflag (!%p199_p3), [#allocation3], %s779_s22  ;;  %s208_s26 = scalar_lea.vmem (!%p199_p3), [#allocation2], %s430_s24 }
  0x39   : > { %603 = dma.done.wait (%p714_p8), %s205_s25, 256  }
  0x3a   : > { %605 = vsyncadd (%p714_p8), %s205_s25, 4294967040  ;;  %v637_v0 = vmov 0.0|0.0   ;;  %vm638_vm0 = vmmov 0   ;;  %v639_v1 = vmov 0.0   ;;  %v640_v2 = vmov 0   ;;  %v234_v3 = vld [vmem:[%s208_s26] sm:$0xff] }
  0x3b   : > { %448 = vmatprep.subr.bf16.mxu0 %v637_v0  ;;  %445 = vmatprep.mubr.msk.f32.mxu0 %vm638_vm0, %v639_v1  ;;  %v235_v4 = vld [vmem:[%s208_s26 + $0x8] sm:$0xff]  ;;  %v310_v6 = vld [vmem:[%s852_s2] sm:$0xff]  ;;  %vm236_vm1 = vcmask 130048   ;;  %s431_s5 = sshll.u32 %s779_s22, 3  ;;  %s434_s7 = sshll.u32 %s624_s18, 7  ;;  %vm324_vm2 = vcmask 523264  }
  0x3c   : > { %519 = vset.pattern.permute.xlu0 %v640_v2  ;;  %v449_v5 = vpack.c.bf16 %v235_v4, %v234_v3  ;;  %v233_v7 = vld [vmem:[%s851_s1] sm:$0xff]  ;;  %s232_s8 = scalar_lea.vmem [#allocation5], %s431_s5  ;;  %s801_s24 = scalar_lea.hbm %s854_s4, %s434_s7 }
  0x3d   : > { %313 = vperm.xlu0 %519, %v310_v6   ;;  %v317_v8 = vld [vmem:[%s853_s3] sm:$0xff]  ;;  %s341_s9 = sshll.u32 %s232_s8, 4  ;;  %s327_s25 = scalar_lea.sflag [#allocation4], %s779_s22  ;;  %s803_s9 = int_to_ptr.vmem [resolvable:$true] %s341_s9 }
  0x3e   : > { %450 = vmatpush3.bf16.msra.mxu0 %v449_v5  ;;  %s550_s18 = scalar_lea.vmem %s803_s9, 128  ;;  %p862_p9 = scmp.ne.s32.totalorder %s858_s28, 0 }
  0x3f   : > { %p551_p8 = scmp.ne.s32.totalorder %s803_s9, %s550_s18  ;;  %s641_s26 = smov [#allocation5]  }
  0x40   : > { %s554_s10 = sshll.u32 %s641_s26, 4  ;;  %s555_s10 = int_to_ptr.vmem [resolvable:$false] %s554_s10 }
  0x41   : > { %446 = vmatmul.mubr.msk.f32.vlgmr.msra.gmra.mrb[0].mxu0 %vm236_vm1, %v233_v7  ;;  %320 = vperm.xlu0 %519, %v317_v8   ;;  %p552_p11 = pnand %p551_p8, %p862_p9  ;;  %s556_s12 = scalar_lea.vmem %s555_s10, 256 }
  0x42   : > { %p557_p6 = scmp.lt.s32.totalorder %s803_s9, %s555_s10  ;;  %p558_p13 = scmp.lt.s32.totalorder %s556_s12, %s550_s18 }
  0x43   : > { %p553_p0 = pneg %p552_p11 }
  0x44   : > { %p559_p2 = por %p558_p13, %p557_p6 }
  0x46   : > { %p560_p5 = pnand %p559_p2, %p553_p0 }
  0xbc   : > { %v314_v9 = vpop.permute.xlu0 %313 }
  0xc0   : > { %v321_v13 = vpop.permute.xlu0 %320 }
 0x114   : > { %v306_v10 = vpop.f32.mrb[0].mxu0 }
 0x115   : > { %v316_v11 = vmul.f32 %v314_v9, %v306_v10  ;;  %v447_v12 = vpop.f32.mrb[1].mxu0 }
 0x117   : > { %v323_v14 = vadd.f32 %v321_v13, %v316_v11 }
 0x119   : > { %325 = vst.msk [vmem:[%s232_s8] sm:$0xff] %vm324_vm2, %v323_v14 }
 0x11a   : > { %563 = shalt.err (!%p560_p5)
}
 0x11b   : > { %s564_s22 = scalar_lea.hbm %s801_s24, 128  ;;  %s568_s14 = scalar_lea.hbm %s854_s4, 256 }
 0x11c   : > { %p565_p4 = scmp.ne.s32.totalorder %s801_s24, %s564_s22  ;;  %p569_p12 = scmp.lt.u32.totalorder %s801_s24, %s854_s4 }
 0x11d   : > { %p570_p1 = scmp.lt.u32.totalorder %s568_s14, %s564_s22  ;;  %p572_p8 = scmp.lt.u32.totalorder %s564_s22, %s801_s24 }
 0x11e   : > { %p566_p7 = pnand %p565_p4, %p862_p9 }
 0x11f   : > { %p571_p3 = por %p570_p1, %p569_p12 }
 0x120   : > { %p567_p10 = pneg %p566_p7 }
 0x121   : > { %p573_p11 = por %p572_p8, %p571_p3 }
 0x123   : > { %p574_p0 = pnand %p573_p11, %p567_p10 }
 0x125   : > { %577 = shalt.err (!%p574_p0)
}
 0x126   : > { %453 = dma.vmem_to_hbm [thread:$0]  (%p862_p9), %s803_s9, 128, %s801_s24, %s327_s25  }
 0x127 PF: > { %s353_s7 = sand.u32 1, %s612_s15   ;;  %p863_p6 = scmp.ne.s32.totalorder %s859_s30, 0 }
 0x128   : > { %p864_p13 = scmp.ge.s32.totalorder %s632_s20, 2  ;;  %s354_s8 = scalar_lea.sflag [#allocation4], %s353_s7 }
 0x12a   : > { %p460_p2 = pnand %p864_p13, %p863_p6 }
 0x12c   : > { %607 = dma.done.wait (!%p460_p2), %s354_s8, 128  }
 0x12d   : > { %609 = vsyncadd (!%p460_p2), %s354_s8, 4294967168  ;;  %s20_s20 = sadd.s32 1, %s632_s20   ;;  %s865_s15 = smov %s616_s16 }
 0x12e   : > { %p17_p5 = scmp.ge.s32.totalorder %s20_s20, 4   ;;  %s866_s16 = smov %s620_s17 }
 0x12f   : > { %s867_s17 = smov %s723_s29  ;;  %s868_s18 = smov %s628_s19 }
 0x130   : > { %s869_s19 = smov %s871_s23  ;;  %19 = sbr.rel (!%p17_p5) target bundleno = 6 (0x6), region = 81 }
 0x137   :  { %359 = vsyncpa [#allocation3], 1 }
 0x138   :  { %361 = vsyncpa [#allocation3 + $0x1], 1 }
 0x139   :  { %362 = vsyncpa [#allocation4], 1 }
 0x13a   :  { %364 = vsyncpa [#allocation4 + $0x1], 1 }

</bundles_post_ra>
